<compile_context>
chip_gen: v7x
topology: tpu7x:2x2x1
jax: 0.10.0
libtpu: 0.0.40
codegen_flags: <defaults>
</compile_context>

<pallas_src>
import functools

import jax
import jax.numpy as jnp
from jax.experimental import pallas as pl
from jax.experimental.pallas import tpu as pltpu

_LANE = 128


# ------------------------------ small helpers --------------------------------
def _round_up(n, m):
    return ((n + m - 1) // m) * m


def _pad2d(x, rows, cols):
    return jnp.pad(x, ((0, rows - x.shape[0]), (0, cols - x.shape[1])))


def _pick_tile(dim, prefer=512, keep_two=False):
    """Largest tile in {512,256,128} (<= prefer) dividing `dim` (a 128-multiple).

    If keep_two, prefer tiles that leave >= 2 tiles along the dim so the
    'parallel' grid axis can be sharded across v7x's two TensorCores.
    """
    for t in (512, 256, 128):
        if t > prefer or dim % t != 0:
            continue
        if keep_two and t > 128 and dim // t < 2:
            continue
        return t
    return 128


def _vmem_budget_bytes():
    """~75% of physical VMEM, capped: ~96 MiB on v5e/v6e, ~48 MiB on v7x."""
    try:
        cap = pltpu.get_tpu_info().vmem_capacity_bytes
    except Exception:
        cap = 64 * 1024 * 1024  # conservative (v7x-sized) fallback
    return max(32 * 1024 * 1024, min(int(cap) * 3 // 4, 96 * 1024 * 1024))


# --------------------------- fused per-layer kernel ---------------------------
def _fused_gcn_layer_kernel(a_ref, h_ref, w_ref, bias_ref, o_ref,
                            xw_ref, acc_ref, *, tk, apply_relu):
    """out[i] = A_hat[i, :] @ (H @ W) + bias, with XW resident in VMEM.

    Grid: (row tiles of A_hat, contraction tiles over N). H and W are fully
    resident (constant index maps); XW is (re)computed at k==0 for each row
    tile into a VMEM scratch — redundant MXU work across row tiles, but zero
    extra HBM traffic, and it keeps the kernel correct when the parallel row
    axis is split across TensorCores (each core owns its own scratch).
    """
    k = pl.program_id(1)

    @pl.when(k == 0)
    def _():
        xw_ref[...] = jnp.dot(
            h_ref[...], w_ref[...], preferred_element_type=jnp.float32
        ).astype(xw_ref.dtype)
        acc_ref[...] = jnp.zeros_like(acc_ref)

    off = pl.multiple_of(k * tk, tk)
    acc_ref[...] += jnp.dot(
        a_ref[...], xw_ref[pl.ds(off, tk), :],
        preferred_element_type=jnp.float32,
    )

    @pl.when(k == pl.num_programs(1) - 1)
    def _():
        out = acc_ref[...] + bias_ref[...]          # bias (1, fout) broadcasts
        if apply_relu:
            out = jnp.maximum(out, 0.0)
        o_ref[...] = out.astype(o_ref.dtype)


def fused_gcn_layer(a_p, h, w_p, bias_p, *, apply_relu, out_dtype,
                    tm, tk, vmem_limit):
    n_pad = a_p.shape[0]
    fin_pad = h.shape[1]
    fout_pad = w_p.shape[1]
    bias2d = bias_p.reshape(1, fout_pad)

    kernel = functools.partial(_fused_gcn_layer_kernel,
                               tk=tk, apply_relu=apply_relu)
    return pl.pallas_call(
        kernel,
        out_shape=jax.ShapeDtypeStruct((n_pad, fout_pad), out_dtype),
        grid_spec=pltpu.PrefetchScalarGridSpec(
            num_scalar_prefetch=0,
            grid=(n_pad // tm, n_pad // tk),
            in_specs=[
                pl.BlockSpec((tm, tk), lambda i, k: (i, k)),              # A_hat
                pl.BlockSpec((n_pad, fin_pad), lambda i, k: (0, 0)),      # H (resident)
                pl.BlockSpec((fin_pad, fout_pad), lambda i, k: (0, 0)),   # W (resident)
                pl.BlockSpec((1, fout_pad), lambda i, k: (0, 0)),         # bias
            ],
            out_specs=pl.BlockSpec((tm, fout_pad), lambda i, k: (i, 0)),
            scratch_shapes=[
                pltpu.VMEM((n_pad, fout_pad), jnp.bfloat16),  # resident XW
                pltpu.VMEM((tm, fout_pad), jnp.float32),      # f32 accumulator
            ],
        ),
        compiler_params=pltpu.CompilerParams(
            dimension_semantics=("parallel", "arbitrary"),
            vmem_limit_bytes=vmem_limit,
        ),
    )(a_p, h, w_p, bias2d)


def _fused_footprint_bytes(n_pad, fin_pad, fout_pad, tm, tk, out_bytes):
    """Conservative VMEM estimate for the fused kernel (x2 for pipelining)."""
    return (2 * tm * tk * 2                 # A_hat tile (bf16, double-buffered)
            + 2 * n_pad * fin_pad * 2       # H resident (count x2 to be safe)
            + 2 * fin_pad * fout_pad * 2    # W resident (count x2 to be safe)
            + 2 * tm * fout_pad * out_bytes  # out tile (double-buffered)
            + n_pad * fout_pad * 2          # XW scratch (bf16)
            + tm * fout_pad * 4)            # f32 accumulator


# ------------------ generic tiled matmul (unfused fallback) -------------------
def _matmul_bias_act_kernel(a_ref, b_ref, bias_ref, o_ref, acc_ref, *, apply_relu):
    """Tiled C = A @ B + bias (optional ReLU). f32 accumulate in VMEM scratch."""
    k = pl.program_id(2)

    @pl.when(k == 0)
    def _():
        acc_ref[...] = jnp.zeros_like(acc_ref)

    acc_ref[...] += jnp.dot(
        a_ref[...], b_ref[...], preferred_element_type=jnp.float32
    )

    @pl.when(k == pl.num_programs(2) - 1)
    def _():
        out = acc_ref[...] + bias_ref[...]
        if apply_relu:
            out = jnp.maximum(out, 0.0)
        o_ref[...] = out.astype(o_ref.dtype)


def tiled_matmul(a, b, bias, *, apply_relu, out_dtype, tm, tn, tk, vmem_limit):
    m, ka = a.shape
    kb, n = b.shape
    assert ka == kb, (ka, kb)
    assert m % tm == 0 and n % tn == 0 and ka % tk == 0, (m, n, ka, tm, tn, tk)

    bias2d = bias.reshape(1, n).astype(jnp.float32)
    kernel = functools.partial(_matmul_bias_act_kernel, apply_relu=apply_relu)

    return pl.pallas_call(
        kernel,
        out_shape=jax.ShapeDtypeStruct((m, n), out_dtype),
        grid_spec=pltpu.PrefetchScalarGridSpec(
            num_scalar_prefetch=0,
            grid=(m // tm, n // tn, ka // tk),
            in_specs=[
                pl.BlockSpec((tm, tk), lambda i, j, k: (i, k)),
                pl.BlockSpec((tk, tn), lambda i, j, k: (k, j)),
                pl.BlockSpec((1, tn), lambda i, j, k: (0, j)),
            ],
            out_specs=pl.BlockSpec((tm, tn), lambda i, j, k: (i, j)),
            scratch_shapes=[pltpu.VMEM((tm, tn), jnp.float32)],
        ),
        compiler_params=pltpu.CompilerParams(
            dimension_semantics=("parallel", "parallel", "arbitrary"),
            vmem_limit_bytes=vmem_limit,
        ),
    )(a, b, bias2d)


# ------------------------------- JAX glue ------------------------------------
def build_norm_adj(edge_index, edge_weight, num_nodes, dtype=jnp.float32):
    """Dense D^{-1/2} (A + I) D^{-1/2}, matching PyG gcn_norm (add_self_loops)."""
    src = edge_index[0]
    dst = edge_index[1]
    if edge_weight is None:
        edge_weight = jnp.ones(src.shape[0], dtype)
    a = jnp.zeros((num_nodes, num_nodes), dtype).at[dst, src].add(edge_weight)
    a = a + jnp.eye(num_nodes, dtype=dtype)          # self loops, weight 1.0
    deg = a.sum(axis=1)
    dinv_sqrt = jnp.where(deg > 0, 1.0 / jnp.sqrt(deg), 0.0)
    return dinv_sqrt[:, None] * a * dinv_sqrt[None, :]


def _glorot(key, fan_in, fan_out):
    limit = jnp.sqrt(6.0 / (fan_in + fan_out))
    return jax.random.uniform(key, (fan_in, fan_out), jnp.float32, -limit, limit)


def init_gcn_params(key, in_channels, hidden_channels, out_channels, nlayer=2):
    n_convs = 2 + max(nlayer - 2, 0)
    keys = jax.random.split(key, n_convs)
    params = [(_glorot(keys[0], in_channels, hidden_channels),
               jnp.zeros((hidden_channels,), jnp.float32))]
    for i in range(max(nlayer - 2, 0)):
        params.append((_glorot(keys[1 + i], hidden_channels, hidden_channels),
                       jnp.zeros((hidden_channels,), jnp.float32)))
    params.append((_glorot(keys[-1], hidden_channels, out_channels),
                   jnp.zeros((out_channels,), jnp.float32)))
    return params


def prepare_gcn(params, edge_index, edge_weight, num_nodes):
    """Hoisted out of the per-forward path: build + pad + cast A_hat and
    weights exactly once (these are constants across forward calls)."""
    n_pad = _round_up(num_nodes, _LANE)
    a_hat = build_norm_adj(edge_index, edge_weight, num_nodes, jnp.float32)
    a_p = _pad2d(a_hat, n_pad, n_pad).astype(jnp.bfloat16)

    prepared = []
    for w, b in params:
        f_in, f_out = w.shape
        fin_p, fout_p = _round_up(f_in, _LANE), _round_up(f_out, _LANE)
        prepared.append((
            _pad2d(w, fin_p, fout_p).astype(jnp.bfloat16),
            jnp.pad(b, (0, fout_p - f_out)).astype(jnp.float32),
        ))
    return a_p, tuple(prepared)


@functools.partial(jax.jit, static_argnames=("num_nodes", "out_channels"))
def gcn_forward(a_p, prepared_params, x, *, num_nodes, out_channels):
    """Eval-mode forward on pre-padded bf16 A_hat / weights."""
    n_pad = a_p.shape[0]
    vmem_limit = _vmem_budget_bytes()

    h = _pad2d(x, n_pad, _round_up(x.shape[1], _LANE)).astype(jnp.bfloat16)

    num_layers = len(prepared_params)
    for li, (w_p, b_p) in enumerate(prepared_params):
        fin_p, fout_p = w_p.shape
        assert h.shape[1] == fin_p, (h.shape, w_p.shape)
        is_last = li == num_layers - 1
        apply_relu = not is_last
        out_dtype = jnp.float32 if is_last else jnp.bfloat16
        out_bytes = jnp.dtype(out_dtype).itemsize

        tm = _pick_tile(n_pad, prefer=512, keep_two=True)   # keep 2 TCs busy
        tk = _pick_tile(n_pad, prefer=512)

        footprint = _fused_footprint_bytes(n_pad, fin_p, fout_p, tm, tk, out_bytes)
        if footprint + (8 << 20) <= vmem_limit:
            # Fused: XW never touches HBM.
            h = fused_gcn_layer(a_p, h, w_p, b_p, apply_relu=apply_relu,
                                out_dtype=out_dtype, tm=tm, tk=tk,
                                vmem_limit=vmem_limit)
        else:
            # Fallback for very large graphs / feature dims: two calls,
            # XW round-trips HBM, but with large lane-dense tiles.
            zero_b = jnp.zeros((fout_p,), jnp.float32)
            xw = tiled_matmul(h, w_p, zero_b, apply_relu=False,
                              out_dtype=jnp.bfloat16,
                              tm=tm, tn=_pick_tile(fout_p), tk=_pick_tile(fin_p),
                              vmem_limit=vmem_limit)
            h = tiled_matmul(a_p, xw, b_p, apply_relu=apply_relu,
                             out_dtype=out_dtype,
                             tm=tm, tn=_pick_tile(fout_p), tk=tk,
                             vmem_limit=vmem_limit)

    return h[:num_nodes, :out_channels]


# --------------------------------- main ---------------------------------------
if __name__ == "__main__":
    key = jax.random.PRNGKey(0)
    k_param, k_x = jax.random.split(key)

    num_nodes = 16
    in_channels, hidden_channels, out_channels = 8, 32, 16
    nlayer = 2

    x = jax.random.normal(k_x, (num_nodes, in_channels), jnp.float32)

    # Small bidirectional ring graph.
    src = jnp.arange(num_nodes, dtype=jnp.int32)
    dst = (src + 1) % num_nodes
    edge_index = jnp.stack(
        [jnp.concatenate([src, dst]), jnp.concatenate([dst, src])], axis=0
    )

    params = init_gcn_params(k_param, in_channels, hidden_channels,
                             out_channels, nlayer=nlayer)

    # Hoisted graph/weight preparation (done once, outside the forward path).
    a_p, prepared = prepare_gcn(params, edge_index, None, num_nodes)

    out = gcn_forward(a_p, prepared, x, num_nodes=num_nodes,
                      out_channels=out_channels)
    jax.block_until_ready(out)
    assert out.shape == (num_nodes, out_channels), out.shape
    assert bool(jnp.all(jnp.isfinite(out)))
    print("KERNEL_OK")
</pallas_src>

<mosaic_0001>
module attributes {stable_mosaic.version = 11 : i64} {
  func.func @_fused_gcn_layer_kernel(%arg0: i32, %arg1: i32, %arg2: memref<128x128xbf16, #tpu.memory_space<vmem>>, %arg3: memref<128x128xbf16, #tpu.memory_space<vmem>>, %arg4: memref<128x128xbf16, #tpu.memory_space<vmem>>, %arg5: memref<1x128xf32, #tpu.memory_space<vmem>>, %arg6: memref<128x128xbf16, #tpu.memory_space<vmem>>, %arg7: memref<128x128xbf16, #tpu.memory_space<vmem>>, %arg8: memref<128x128xf32, #tpu.memory_space<vmem>>) attributes {dimension_semantics = [#tpu.dimension_semantics<parallel>, #tpu.dimension_semantics<arbitrary>], iteration_bounds = array<i64: 1, 1>, scalar_prefetch = 0 : i64, scratch_operands = 2 : i64, tpu.core_type = #tpu.core_type<tc>, window_params = [{transform_indices = @transform_0, window_bounds = array<i64: 128, 128>}, {pipeline_mode = #tpu.pipeline_mode<synchronous>, transform_indices = @transform_1, window_bounds = array<i64: 128, 128>}, {pipeline_mode = #tpu.pipeline_mode<synchronous>, transform_indices = @transform_2, window_bounds = array<i64: 128, 128>}, {pipeline_mode = #tpu.pipeline_mode<synchronous>, transform_indices = @transform_3, window_bounds = array<i64: 1, 128>}, {transform_indices = @transform_4, window_bounds = array<i64: 128, 128>}]} {
    %c0_i32 = arith.constant 0 : i32
    %0 = arith.cmpi eq, %arg1, %c0_i32 : i32
    %1 = arith.extui %0 : i1 to i32
    %c0_i32_0 = arith.constant 0 : i32
    %2 = arith.cmpi ne, %1, %c0_i32_0 : i32
    scf.if %2 {
      %c0_9 = arith.constant 0 : index
      %c0_10 = arith.constant 0 : index
      %15 = vector.load %arg3[%c0_9, %c0_10] : memref<128x128xbf16, #tpu.memory_space<vmem>>, vector<128x128xbf16>
      %c0_11 = arith.constant 0 : index
      %c0_12 = arith.constant 0 : index
      %16 = vector.load %arg4[%c0_11, %c0_12] : memref<128x128xbf16, #tpu.memory_space<vmem>>, vector<128x128xbf16>
      %cst_13 = arith.constant dense<0.000000e+00> : vector<128x128xf32>
      %17 = tpu.matmul %15, %16, %cst_13 {dimension_numbers = #tpu.dot_dimension_numbers<[1], [0], [0], [1], [0, 0, 1, 1], [], []>} : vector<128x128xbf16>, vector<128x128xbf16>, vector<128x128xf32> -> vector<128x128xf32>
      %18 = arith.truncf %17 : vector<128x128xf32> to vector<128x128xbf16>
      %c0_14 = arith.constant 0 : index
      %c0_15 = arith.constant 0 : index
      %19 = vector.load %arg7[%c0_14, %c0_15] : memref<128x128xbf16, #tpu.memory_space<vmem>>, vector<128x128xbf16>
      tpu.vector_store %arg7[%c0_14, %c0_15], %18 {strides = array<i32>} : memref<128x128xbf16, #tpu.memory_space<vmem>>, vector<128x128xbf16>,
      %cst_16 = arith.constant 0.000000e+00 : f32
      %20 = vector.broadcast %cst_16 : f32 to vector<128x128xf32>
      %c0_17 = arith.constant 0 : index
      %c0_18 = arith.constant 0 : index
      %21 = vector.load %arg8[%c0_17, %c0_18] : memref<128x128xf32, #tpu.memory_space<vmem>>, vector<128x128xf32>
      tpu.vector_store %arg8[%c0_17, %c0_18], %20 {strides = array<i32>} : memref<128x128xf32, #tpu.memory_space<vmem>>, vector<128x128xf32>,
    } else {
    }
    %c128_i32 = arith.constant 128 : i32
    %3 = arith.muli %arg1, %c128_i32 : i32
    %4 = tpu.assume_multiple %3, 128 : i32
    %c0 = arith.constant 0 : index
    %c0_1 = arith.constant 0 : index
    %5 = vector.load %arg8[%c0, %c0_1] : memref<128x128xf32, #tpu.memory_space<vmem>>, vector<128x128xf32>
    %c0_2 = arith.constant 0 : index
    %c0_3 = arith.constant 0 : index
    %6 = vector.load %arg2[%c0_2, %c0_3] : memref<128x128xbf16, #tpu.memory_space<vmem>>, vector<128x128xbf16>
    %7 = arith.index_cast %4 : i32 to index
    %c0_4 = arith.constant 0 : index
    %8 = vector.load %arg7[%7, %c0_4] : memref<128x128xbf16, #tpu.memory_space<vmem>>, vector<128x128xbf16>
    %cst = arith.constant dense<0.000000e+00> : vector<128x128xf32>
    %9 = tpu.matmul %6, %8, %cst {dimension_numbers = #tpu.dot_dimension_numbers<[1], [0], [0], [1], [0, 0, 1, 1], [], []>} : vector<128x128xbf16>, vector<128x128xbf16>, vector<128x128xf32> -> vector<128x128xf32>
    %10 = arith.addf %5, %9 : vector<128x128xf32>
    %c0_5 = arith.constant 0 : index
    %c0_6 = arith.constant 0 : index
    %11 = vector.load %arg8[%c0_5, %c0_6] : memref<128x128xf32, #tpu.memory_space<vmem>>, vector<128x128xf32>
    tpu.vector_store %arg8[%c0_5, %c0_6], %10 {strides = array<i32>} : memref<128x128xf32, #tpu.memory_space<vmem>>, vector<128x128xf32>,
    %c0_i32_7 = arith.constant 0 : i32
    %12 = arith.cmpi eq, %arg1, %c0_i32_7 : i32
    %13 = arith.extui %12 : i1 to i32
    %c0_i32_8 = arith.constant 0 : i32
    %14 = arith.cmpi ne, %13, %c0_i32_8 : i32
    scf.if %14 {
      %c0_9 = arith.constant 0 : index
      %c0_10 = arith.constant 0 : index
      %15 = vector.load %arg8[%c0_9, %c0_10] : memref<128x128xf32, #tpu.memory_space<vmem>>, vector<128x128xf32>
      %c0_11 = arith.constant 0 : index
      %c0_12 = arith.constant 0 : index
      %16 = vector.load %arg5[%c0_11, %c0_12] : memref<1x128xf32, #tpu.memory_space<vmem>>, vector<1x128xf32>
      %17 = vector.broadcast %16 : vector<1x128xf32> to vector<128x128xf32>
      %18 = arith.addf %15, %17 : vector<128x128xf32>
      %cst_13 = arith.constant 0.000000e+00 : f32
      %19 = vector.broadcast %cst_13 : f32 to vector<128x128xf32>
      %20 = arith.maximumf %18, %19 : vector<128x128xf32>
      %21 = arith.truncf %20 : vector<128x128xf32> to vector<128x128xbf16>
      %c0_14 = arith.constant 0 : index
      %c0_15 = arith.constant 0 : index
      %22 = vector.load %arg6[%c0_14, %c0_15] : memref<128x128xbf16, #tpu.memory_space<vmem>>, vector<128x128xbf16>
      tpu.vector_store %arg6[%c0_14, %c0_15], %21 {strides = array<i32>} : memref<128x128xbf16, #tpu.memory_space<vmem>>, vector<128x128xbf16>,
    } else {
    }
    return
  }
  func.func @transform_0(%arg0: i32, %arg1: i32) -> (i32, i32) {
    %c0_i32 = arith.constant 0 : i32
    return %arg0, %arg1 : i32, i32
  }
  func.func @transform_1(%arg0: i32, %arg1: i32) -> (i32, i32) {
    %c0_i32 = arith.constant 0 : i32
    %c0_i32_0 = arith.constant 0 : i32
    %c0_i32_1 = arith.constant 0 : i32
    return %c0_i32, %c0_i32_0 : i32, i32
  }
  func.func @transform_2(%arg0: i32, %arg1: i32) -> (i32, i32) {
    %c0_i32 = arith.constant 0 : i32
    %c0_i32_0 = arith.constant 0 : i32
    %c0_i32_1 = arith.constant 0 : i32
    return %c0_i32, %c0_i32_0 : i32, i32
  }
  func.func @transform_3(%arg0: i32, %arg1: i32) -> (i32, i32) {
    %c0_i32 = arith.constant 0 : i32
    %c0_i32_0 = arith.constant 0 : i32
    %c0_i32_1 = arith.constant 0 : i32
    return %c0_i32, %c0_i32_0 : i32, i32
  }
  func.func @transform_4(%arg0: i32, %arg1: i32) -> (i32, i32) {
    %c0_i32 = arith.constant 0 : i32
    %c0_i32_0 = arith.constant 0 : i32
    return %arg0, %c0_i32 : i32, i32
  }
}

module attributes {stable_mosaic.version = 11 : i64} {
  func.func @_fused_gcn_layer_kernel(%arg0: i32, %arg1: i32, %arg2: memref<128x128xbf16, #tpu.memory_space<vmem>>, %arg3: memref<128x128xbf16, #tpu.memory_space<vmem>>, %arg4: memref<128x128xbf16, #tpu.memory_space<vmem>>, %arg5: memref<1x128xf32, #tpu.memory_space<vmem>>, %arg6: memref<128x128xf32, #tpu.memory_space<vmem>>, %arg7: memref<128x128xbf16, #tpu.memory_space<vmem>>, %arg8: memref<128x128xf32, #tpu.memory_space<vmem>>) attributes {dimension_semantics = [#tpu.dimension_semantics<parallel>, #tpu.dimension_semantics<arbitrary>], iteration_bounds = array<i64: 1, 1>, scalar_prefetch = 0 : i64, scratch_operands = 2 : i64, tpu.core_type = #tpu.core_type<tc>, window_params = [{transform_indices = @transform_0, window_bounds = array<i64: 128, 128>}, {pipeline_mode = #tpu.pipeline_mode<synchronous>, transform_indices = @transform_1, window_bounds = array<i64: 128, 128>}, {pipeline_mode = #tpu.pipeline_mode<synchronous>, transform_indices = @transform_2, window_bounds = array<i64: 128, 128>}, {pipeline_mode = #tpu.pipeline_mode<synchronous>, transform_indices = @transform_3, window_bounds = array<i64: 1, 128>}, {transform_indices = @transform_4, window_bounds = array<i64: 128, 128>}]} {
    %c0_i32 = arith.constant 0 : i32
    %0 = arith.cmpi eq, %arg1, %c0_i32 : i32
    %1 = arith.extui %0 : i1 to i32
    %c0_i32_0 = arith.constant 0 : i32
    %2 = arith.cmpi ne, %1, %c0_i32_0 : i32
    scf.if %2 {
      %c0_9 = arith.constant 0 : index
      %c0_10 = arith.constant 0 : index
      %15 = vector.load %arg3[%c0_9, %c0_10] : memref<128x128xbf16, #tpu.memory_space<vmem>>, vector<128x128xbf16>
      %c0_11 = arith.constant 0 : index
      %c0_12 = arith.constant 0 : index
      %16 = vector.load %arg4[%c0_11, %c0_12] : memref<128x128xbf16, #tpu.memory_space<vmem>>, vector<128x128xbf16>
      %cst_13 = arith.constant dense<0.000000e+00> : vector<128x128xf32>
      %17 = tpu.matmul %15, %16, %cst_13 {dimension_numbers = #tpu.dot_dimension_numbers<[1], [0], [0], [1], [0, 0, 1, 1], [], []>} : vector<128x128xbf16>, vector<128x128xbf16>, vector<128x128xf32> -> vector<128x128xf32>
      %18 = arith.truncf %17 : vector<128x128xf32> to vector<128x128xbf16>
      %c0_14 = arith.constant 0 : index
      %c0_15 = arith.constant 0 : index
      %19 = vector.load %arg7[%c0_14, %c0_15] : memref<128x128xbf16, #tpu.memory_space<vmem>>, vector<128x128xbf16>
      tpu.vector_store %arg7[%c0_14, %c0_15], %18 {strides = array<i32>} : memref<128x128xbf16, #tpu.memory_space<vmem>>, vector<128x128xbf16>,
      %cst_16 = arith.constant 0.000000e+00 : f32
      %20 = vector.broadcast %cst_16 : f32 to vector<128x128xf32>
      %c0_17 = arith.constant 0 : index
      %c0_18 = arith.constant 0 : index
      %21 = vector.load %arg8[%c0_17, %c0_18] : memref<128x128xf32, #tpu.memory_space<vmem>>, vector<128x128xf32>
      tpu.vector_store %arg8[%c0_17, %c0_18], %20 {strides = array<i32>} : memref<128x128xf32, #tpu.memory_space<vmem>>, vector<128x128xf32>,
    } else {
    }
    %c128_i32 = arith.constant 128 : i32
    %3 = arith.muli %arg1, %c128_i32 : i32
    %4 = tpu.assume_multiple %3, 128 : i32
    %c0 = arith.constant 0 : index
    %c0_1 = arith.constant 0 : index
    %5 = vector.load %arg8[%c0, %c0_1] : memref<128x128xf32, #tpu.memory_space<vmem>>, vector<128x128xf32>
    %c0_2 = arith.constant 0 : index
    %c0_3 = arith.constant 0 : index
    %6 = vector.load %arg2[%c0_2, %c0_3] : memref<128x128xbf16, #tpu.memory_space<vmem>>, vector<128x128xbf16>
    %7 = arith.index_cast %4 : i32 to index
    %c0_4 = arith.constant 0 : index
    %8 = vector.load %arg7[%7, %c0_4] : memref<128x128xbf16, #tpu.memory_space<vmem>>, vector<128x128xbf16>
    %cst = arith.constant dense<0.000000e+00> : vector<128x128xf32>
    %9 = tpu.matmul %6, %8, %cst {dimension_numbers = #tpu.dot_dimension_numbers<[1], [0], [0], [1], [0, 0, 1, 1], [], []>} : vector<128x128xbf16>, vector<128x128xbf16>, vector<128x128xf32> -> vector<128x128xf32>
    %10 = arith.addf %5, %9 : vector<128x128xf32>
    %c0_5 = arith.constant 0 : index
    %c0_6 = arith.constant 0 : index
    %11 = vector.load %arg8[%c0_5, %c0_6] : memref<128x128xf32, #tpu.memory_space<vmem>>, vector<128x128xf32>
    tpu.vector_store %arg8[%c0_5, %c0_6], %10 {strides = array<i32>} : memref<128x128xf32, #tpu.memory_space<vmem>>, vector<128x128xf32>,
    %c0_i32_7 = arith.constant 0 : i32
    %12 = arith.cmpi eq, %arg1, %c0_i32_7 : i32
    %13 = arith.extui %12 : i1 to i32
    %c0_i32_8 = arith.constant 0 : i32
    %14 = arith.cmpi ne, %13, %c0_i32_8 : i32
    scf.if %14 {
      %c0_9 = arith.constant 0 : index
      %c0_10 = arith.constant 0 : index
      %15 = vector.load %arg8[%c0_9, %c0_10] : memref<128x128xf32, #tpu.memory_space<vmem>>, vector<128x128xf32>
      %c0_11 = arith.constant 0 : index
      %c0_12 = arith.constant 0 : index
      %16 = vector.load %arg5[%c0_11, %c0_12] : memref<1x128xf32, #tpu.memory_space<vmem>>, vector<1x128xf32>
      %17 = vector.broadcast %16 : vector<1x128xf32> to vector<128x128xf32>
      %18 = arith.addf %15, %17 : vector<128x128xf32>
      %c0_13 = arith.constant 0 : index
      %c0_14 = arith.constant 0 : index
      %19 = vector.load %arg6[%c0_13, %c0_14] : memref<128x128xf32, #tpu.memory_space<vmem>>, vector<128x128xf32>
      tpu.vector_store %arg6[%c0_13, %c0_14], %18 {strides = array<i32>} : memref<128x128xf32, #tpu.memory_space<vmem>>, vector<128x128xf32>,
    } else {
    }
    return
  }
  func.func @transform_0(%arg0: i32, %arg1: i32) -> (i32, i32) {
    %c0_i32 = arith.constant 0 : i32
    return %arg0, %arg1 : i32, i32
  }
  func.func @transform_1(%arg0: i32, %arg1: i32) -> (i32, i32) {
    %c0_i32 = arith.constant 0 : i32
    %c0_i32_0 = arith.constant 0 : i32
    %c0_i32_1 = arith.constant 0 : i32
    return %c0_i32, %c0_i32_0 : i32, i32
  }
  func.func @transform_2(%arg0: i32, %arg1: i32) -> (i32, i32) {
    %c0_i32 = arith.constant 0 : i32
    %c0_i32_0 = arith.constant 0 : i32
    %c0_i32_1 = arith.constant 0 : i32
    return %c0_i32, %c0_i32_0 : i32, i32
  }
  func.func @transform_3(%arg0: i32, %arg1: i32) -> (i32, i32) {
    %c0_i32 = arith.constant 0 : i32
    %c0_i32_0 = arith.constant 0 : i32
    %c0_i32_1 = arith.constant 0 : i32
    return %c0_i32, %c0_i32_0 : i32, i32
  }
  func.func @transform_4(%arg0: i32, %arg1: i32) -> (i32, i32) {
    %c0_i32 = arith.constant 0 : i32
    %c0_i32_0 = arith.constant 0 : i32
    return %arg0, %c0_i32 : i32, i32
  }
}

</mosaic_0001>

<bundles_post_ra>
// kernel: gcn_forward.3
= control target key start
LH: loop header
LB: loop body
LE: loop exit
PB: predicated region body
PF: predicated region fallthrough
CT: control target
= control target key end

     0   :  { %s858_s2 = inlined_call_operand.vmem [shape: bf16[128,128], index: 2, kind: input, shape index: {}]   ;;  %s859_s1 = inlined_call_operand.vmem [shape: bf16[128,128], index: 1, kind: input, shape index: {}]   ;;  %s860_s0 = inlined_call_operand.vmem [shape: bf16[128,128], index: 0, kind: input, shape index: {}]   ;;  %s861_s3 = inlined_call_operand.vmem [shape: f32[1,128], index: 3, kind: input, shape index: {}]   ;;  %s862_s4 = inlined_call_operand.vmem [shape: f32[128,128], index: 4, kind: output, shape index: {}]  }
   0x1   :  { %v686_v0 = vld [vmem:[%s858_s2] sm:$0xff]   ;;  %v687_v1 = vld [vmem:[%s858_s2 + $0x8] sm:$0xff]   ;;  %v688_v2 = vld [vmem:[%s858_s2 + $0x10] sm:$0xff]  }
   0x2   :  { %622 = vmatprep.subr.bf16.mxu0 %v686_v0  ;;  %v689_v3 = vld [vmem:[%s858_s2 + $0x18] sm:$0xff]   ;;  %v694_v4 = vld [vmem:[%s859_s1] sm:$0xff]   ;;  %v691_v6 = vld [vmem:[%s858_s2 + $0x28] sm:$0xff]  }
   0x3   :  { %623 = vmatpush3.bf16.msra.mxu0 %v686_v0  ;;  %638 = vmatprep.mubr.bf16.mxu0 %v694_v4  ;;  %v690_v5 = vld [vmem:[%s858_s2 + $0x20] sm:$0xff]   ;;  %v692_v7 = vld [vmem:[%s858_s2 + $0x30] sm:$0xff]   ;;  %v693_v8 = vld [vmem:[%s858_s2 + $0x38] sm:$0xff]  }
   0x4   :  { %624 = vmatprep.subr.bf16.mxu0 %v687_v1  ;;  %v695_v9 = vld [vmem:[%s859_s1 + $0x8] sm:$0xff]   ;;  %v696_v10 = vld [vmem:[%s859_s1 + $0x10] sm:$0xff]   ;;  %v697_v11 = vld [vmem:[%s859_s1 + $0x18] sm:$0xff]  }
   0x5   :  { %v698_v12 = vld [vmem:[%s859_s1 + $0x20] sm:$0xff]   ;;  %v699_v13 = vld [vmem:[%s859_s1 + $0x28] sm:$0xff]   ;;  %v700_v14 = vld [vmem:[%s859_s1 + $0x30] sm:$0xff]  }
   0x6   :  { %v701_v15 = vld [vmem:[%s859_s1 + $0x38] sm:$0xff]   ;;  %v702_v16 = vld [vmem:[%s860_s0] sm:$0xff]   ;;  %v703_v41 = vld [vmem:[%s860_s0 + $0x8] sm:$0xff]  }
   0x7   :  { %625 = vmatpush3.bf16.msra.mxu0 %v687_v1  ;;  %670 = vmatprep.mubr.bf16.mxu1 %v702_v16  ;;  %v704_v42 = vld [vmem:[%s860_s0 + $0x10] sm:$0xff]   ;;  %v705_v43 = vld [vmem:[%s860_s0 + $0x18] sm:$0xff]   ;;  %v706_v44 = vld [vmem:[%s860_s0 + $0x20] sm:$0xff]  }
   0x8   :  { %626 = vmatprep.subr.bf16.mxu0 %v688_v2  ;;  %v707_v45 = vld [vmem:[%s860_s0 + $0x28] sm:$0xff]   ;;  %v708_v46 = vld [vmem:[%s860_s0 + $0x30] sm:$0xff]   ;;  %v709_v47 = vld [vmem:[%s860_s0 + $0x38] sm:$0xff]  }
   0x9   :  { %v589_v48 = vld [vmem:[%s861_s3] ss:$0 sm:$0xff] }
   0xb   :  { %627 = vmatpush3.bf16.msra.mxu0 %v688_v2 }
   0xc   :  { %628 = vmatprep.subr.bf16.mxu0 %v689_v3 }
   0xf   :  { %629 = vmatpush3.bf16.msra.mxu0 %v689_v3 }
  0x10   :  { %630 = vmatprep.subr.bf16.mxu0 %v690_v5 }
  0x13   :  { %631 = vmatpush3.bf16.msra.mxu0 %v690_v5 }
  0x14   :  { %632 = vmatprep.subr.bf16.mxu0 %v691_v6 }
  0x17   :  { %633 = vmatpush3.bf16.msra.mxu0 %v691_v6 }
  0x18   :  { %634 = vmatprep.subr.bf16.mxu0 %v692_v7 }
  0x1b   :  { %635 = vmatpush3.bf16.msra.mxu0 %v692_v7 }
  0x1c   :  { %636 = vmatprep.subr.bf16.mxu0 %v693_v8 }
  0x1f   :  { %637 = vmatpush3.bf16.msra.mxu0 %v693_v8 }
  0x22   :  { %639 = vmatmul.mubr.bf16.vlgmr.msra.gmra.mrb[0].mxu0 %v695_v9 }
  0x23   :  { %642 = vmatprep.mubr.bf16.mxu0 %v696_v10 }
  0x2a   :  { %643 = vmatmul.mubr.bf16.gmra.mrb[4].mxu0 %v697_v11 }
  0x2b   :  { %646 = vmatprep.mubr.bf16.mxu0 %v698_v12 }
  0x32   :  { %647 = vmatmul.mubr.bf16.gmra.mrb[8].mxu0 %v699_v13 }
  0x33   :  { %650 = vmatprep.mubr.bf16.mxu0 %v700_v14 }
  0x3a   :  { %651 = vmatmul.mubr.bf16.gmra.mrb[12].mxu0 %v701_v15 }
  0xf5   :  { %v640_v17 = vpop.f32.mrb[0].mxu0 }
  0xf6   :  { %v184_v18 = vpop.f32.mrb[1].mxu0 }
  0xf7   :  { %v641_v19 = vpop.f32.mrb[2].mxu0 }
  0xf8   :  { %v248_v20 = vpack.c.bf16 %v641_v19, %v640_v17  ;;  %v187_v21 = vpop.f32.mrb[3].mxu0 }
  0xf9   :  { %v247_v22 = vpack.c.bf16 %v187_v21, %v184_v18 }
  0xfb   :  { %654 = vmatprep.subr.bf16.mxu1 %v247_v22 }
  0xfc   :  { %655 = vmatpush3.bf16.msra.mxu1 %v247_v22 }
  0xfd   :  { %v644_v23 = vpop.f32.mrb[4].mxu0  ;;  %656 = vmatprep.subr.bf16.mxu1 %v248_v20 }
  0xfe   :  { %v200_v24 = vpop.f32.mrb[5].mxu0 }
  0xff   :  { %v645_v25 = vpop.f32.mrb[6].mxu0 }
 0x100   :  { %v250_v26 = vpack.c.bf16 %v645_v25, %v644_v23  ;;  %v203_v27 = vpop.f32.mrb[7].mxu0  ;;  %657 = vmatpush3.bf16.msra.mxu1 %v248_v20 }
 0x101   :  { %v249_v28 = vpack.c.bf16 %v203_v27, %v200_v24 }
 0x103   :  { %658 = vmatprep.subr.bf16.mxu1 %v249_v28 }
 0x104   :  { %659 = vmatpush3.bf16.msra.mxu1 %v249_v28 }
 0x105   :  { %v648_v29 = vpop.f32.mrb[8].mxu0  ;;  %660 = vmatprep.subr.bf16.mxu1 %v250_v26 }
 0x106   :  { %v216_v30 = vpop.f32.mrb[9].mxu0 }
 0x107   :  { %v649_v31 = vpop.f32.mrb[10].mxu0 }
 0x108   :  { %v252_v32 = vpack.c.bf16 %v649_v31, %v648_v29  ;;  %v219_v33 = vpop.f32.mrb[11].mxu0  ;;  %661 = vmatpush3.bf16.msra.mxu1 %v250_v26 }
 0x109   :  { %v251_v34 = vpack.c.bf16 %v219_v33, %v216_v30 }
 0x10b   :  { %662 = vmatprep.subr.bf16.mxu1 %v251_v34 }
 0x10c   :  { %663 = vmatpush3.bf16.msra.mxu1 %v251_v34 }
 0x10d   :  { %v652_v35 = vpop.f32.mrb[12].mxu0  ;;  %664 = vmatprep.subr.bf16.mxu1 %v252_v32 }
 0x10e   :  { %v232_v36 = vpop.f32.mrb[13].mxu0 }
 0x10f   :  { %v653_v37 = vpop.f32.mrb[14].mxu0 }
 0x110   :  { %v254_v38 = vpack.c.bf16 %v653_v37, %v652_v35  ;;  %v235_v39 = vpop.f32.mrb[15].mxu0  ;;  %665 = vmatpush3.bf16.msra.mxu1 %v252_v32 }
 0x111   :  { %v253_v40 = vpack.c.bf16 %v235_v39, %v232_v36 }
 0x113   :  { %666 = vmatprep.subr.bf16.mxu1 %v253_v40 }
 0x114   :  { %667 = vmatpush3.bf16.msra.mxu1 %v253_v40 }
 0x115   :  { %668 = vmatprep.subr.bf16.mxu1 %v254_v38 }
 0x118   :  { %669 = vmatpush3.bf16.msra.mxu1 %v254_v38 }
 0x11b   :  { %671 = vmatmul.mubr.bf16.vlgmr.msra.gmra.mrb[0].mxu1 %v703_v41 }
 0x11c   :  { %674 = vmatprep.mubr.bf16.mxu1 %v704_v42 }
 0x123   :  { %675 = vmatmul.mubr.bf16.gmra.mrb[4].mxu1 %v705_v43 }
 0x124   :  { %678 = vmatprep.mubr.bf16.mxu1 %v706_v44 }
 0x12b   :  { %679 = vmatmul.mubr.bf16.gmra.mrb[8].mxu1 %v707_v45 }
 0x12c   :  { %682 = vmatprep.mubr.bf16.mxu1 %v708_v46 }
 0x133   :  { %683 = vmatmul.mubr.bf16.gmra.mrb[12].mxu1 %v709_v47 }
 0x1ee   :  { %v672_v49 = vpop.f32.mrb[0].mxu1 }
 0x1ef   :  { %v529_v50 = vadd.f32 %v672_v49, %v589_v48  ;;  %v406_v51 = vpop.f32.mrb[1].mxu1 }
 0x1f0   :  { %v527_v52 = vadd.f32 %v589_v48, %v406_v51  ;;  %v673_v53 = vpop.f32.mrb[2].mxu1 }
 0x1f1   :  { %545 = vst [vmem:[%s862_s4 + $0x10] sm:$0xff] %v529_v50  ;;  %v530_v54 = vadd.f32 %v673_v53, %v589_v48  ;;  %v409_v55 = vpop.f32.mrb[3].mxu1 }
 0x1f2   :  { %543 = vst [vmem:[%s862_s4] sm:$0xff] %v527_v52  ;;  %v528_v56 = vadd.f32 %v589_v48, %v409_v55 }
 0x1f3   :  { %546 = vst [vmem:[%s862_s4 + $0x18] sm:$0xff] %v530_v54 }
 0x1f4   :  { %544 = vst [vmem:[%s862_s4 + $0x8] sm:$0xff] %v528_v56 }
 0x1f6   :  { %v676_v57 = vpop.f32.mrb[4].mxu1 }
 0x1f7   :  { %v533_v58 = vadd.f32 %v676_v57, %v589_v48  ;;  %v422_v59 = vpop.f32.mrb[5].mxu1 }
 0x1f8   :  { %v531_v60 = vadd.f32 %v589_v48, %v422_v59  ;;  %v677_v61 = vpop.f32.mrb[6].mxu1 }
 0x1f9   :  { %549 = vst [vmem:[%s862_s4 + $0x30] sm:$0xff] %v533_v58  ;;  %v534_v62 = vadd.f32 %v677_v61, %v589_v48  ;;  %v425_v63 = vpop.f32.mrb[7].mxu1 }
 0x1fa   :  { %547 = vst [vmem:[%s862_s4 + $0x20] sm:$0xff] %v531_v60  ;;  %v532_v0 = vadd.f32 %v589_v48, %v425_v63 }
 0x1fb   :  { %550 = vst [vmem:[%s862_s4 + $0x38] sm:$0xff] %v534_v62 }
 0x1fc   :  { %548 = vst [vmem:[%s862_s4 + $0x28] sm:$0xff] %v532_v0 }
 0x1fe   :  { %v680_v1 = vpop.f32.mrb[8].mxu1 }
 0x1ff   :  { %v537_v2 = vadd.f32 %v680_v1, %v589_v48  ;;  %v438_v3 = vpop.f32.mrb[9].mxu1 }
 0x200   :  { %v535_v4 = vadd.f32 %v589_v48, %v438_v3  ;;  %v681_v5 = vpop.f32.mrb[10].mxu1 }
 0x201   :  { %553 = vst [vmem:[%s862_s4 + $0x50] sm:$0xff] %v537_v2  ;;  %v538_v6 = vadd.f32 %v681_v5, %v589_v48  ;;  %v441_v7 = vpop.f32.mrb[11].mxu1 }
 0x202   :  { %551 = vst [vmem:[%s862_s4 + $0x40] sm:$0xff] %v535_v4  ;;  %v536_v8 = vadd.f32 %v589_v48, %v441_v7 }
 0x203   :  { %554 = vst [vmem:[%s862_s4 + $0x58] sm:$0xff] %v538_v6 }
 0x204   :  { %552 = vst [vmem:[%s862_s4 + $0x48] sm:$0xff] %v536_v8 }
 0x206   :  { %v684_v9 = vpop.f32.mrb[12].mxu1 }
 0x207   :  { %v541_v10 = vadd.f32 %v684_v9, %v589_v48  ;;  %v454_v11 = vpop.f32.mrb[13].mxu1 }
 0x208   :  { %v539_v12 = vadd.f32 %v589_v48, %v454_v11  ;;  %v685_v13 = vpop.f32.mrb[14].mxu1 }
 0x209   :  { %557 = vst [vmem:[%s862_s4 + $0x70] sm:$0xff] %v541_v10  ;;  %v542_v14 = vadd.f32 %v685_v13, %v589_v48  ;;  %v457_v15 = vpop.f32.mrb[15].mxu1 }
 0x20a   :  { %555 = vst [vmem:[%s862_s4 + $0x60] sm:$0xff] %v539_v12  ;;  %v540_v16 = vadd.f32 %v589_v48, %v457_v15 }
 0x20b   :  { %558 = vst [vmem:[%s862_s4 + $0x78] sm:$0xff] %v542_v14 }
 0x20c   :  { %556 = vst [vmem:[%s862_s4 + $0x68] sm:$0xff] %v540_v16 }

// kernel: gcn_forward.2
= control target key start
LH: loop header
LB: loop body
LE: loop exit
PB: predicated region body
PF: predicated region fallthrough
CT: control target
= control target key end

     0   :  { %9 = vsyncpa [#allocation5], 0  ;;  %s911_s15 = smov [#allocation4]   ;;  %s1026_s0 = inlined_call_operand.vmem [shape: bf16[128,128], index: 0, kind: input, shape index: {}]   ;;  %s1027_s1 = inlined_call_operand.vmem [shape: bf16[128,128], index: 1, kind: input, shape index: {}]   ;;  %s1028_s2 = inlined_call_operand.hbm [shape: bf16[128,128], index: 2, kind: input, shape index: {}]   ;;  %s1029_s3 = inlined_call_operand.vmem [shape: f32[1,128], index: 3, kind: input, shape index: {}]   ;;  %s1030_s4 = inlined_call_operand.vmem [shape: bf16[128,128], index: 4, kind: output, shape index: {}]  }
   0x1   :  { %s19_s16 = sshll.u32 %s911_s15, 4  ;;  %s887_s19 = scalar_lea.hbm %s1028_s2, 1024  ;;  %s20_s16 = int_to_ptr.vmem [resolvable:$true] %s19_s16 }
   0x2   :  { %p888_p0 = scmp.ne.s32.totalorder %s1028_s2, %s887_s19  ;;  %p891_p1 = scmp.lt.u32.totalorder %s887_s19, %s1028_s2 }
   0x4   :  { %p893_p2 = pnand %p891_p1, %p888_p0 }
   0x6   :  { %896 = shalt.err (!%p893_p2)
}
   0x7   :  { %s897_s24 = scalar_lea.vmem %s20_s16, 1024  ;;  %p902_p4 = scmp.lt.s32.totalorder %s20_s16, %s20_s16 }
   0x8   :  { %p898_p3 = scmp.ne.s32.totalorder %s20_s16, %s897_s24  ;;  %p903_p5 = scmp.lt.s32.totalorder %s897_s24, %s897_s24 }
   0xa   :  { %p904_p6 = por %p903_p5, %p902_p4 }
   0xc   :  { %p905_p7 = pnand %p904_p6, %p898_p3 }
   0xe   :  { %908 = shalt.err (!%p905_p7)
}
   0xf   :  { %s912_s25 = smov 64   ;;  %s913_s26 = smov 4  }
  0x10   :  { %25 = dma.hbm_to_vmem [thread:$0]  %s1028_s2, 1024, %s20_s16, [#allocation5], %s912_s25, %s912_s25, %s913_s26  }
  0x11   :  { %909 = dma.done.wait [#allocation5], 1024  }
  0x12   :  { %910 = vsyncadd [#allocation5], 4294966272  ;;  %v863_v0 = vld [vmem:[#allocation4] sm:$0xff]   ;;  %v864_v1 = vld [vmem:[#allocation4 + $0x8] sm:$0xff]  }
  0x13   :  { %796 = vmatprep.subr.bf16.mxu0 %v863_v0  ;;  %v865_v2 = vld [vmem:[#allocation4 + $0x10] sm:$0xff]   ;;  %v866_v3 = vld [vmem:[#allocation4 + $0x18] sm:$0xff]   ;;  %v871_v4 = vld [vmem:[%s1027_s1] sm:$0xff]  }
  0x14   :  { %797 = vmatpush3.bf16.msra.mxu0 %v863_v0  ;;  %812 = vmatprep.mubr.bf16.mxu0 %v871_v4  ;;  %v867_v5 = vld [vmem:[#allocation4 + $0x20] sm:$0xff]   ;;  %v868_v6 = vld [vmem:[#allocation4 + $0x28] sm:$0xff]   ;;  %v869_v7 = vld [vmem:[#allocation4 + $0x30] sm:$0xff]  }
  0x15   :  { %798 = vmatprep.subr.bf16.mxu0 %v864_v1  ;;  %v870_v8 = vld [vmem:[#allocation4 + $0x38] sm:$0xff]   ;;  %v872_v9 = vld [vmem:[%s1027_s1 + $0x8] sm:$0xff]   ;;  %v873_v10 = vld [vmem:[%s1027_s1 + $0x10] sm:$0xff]  }
  0x16   :  { %v874_v11 = vld [vmem:[%s1027_s1 + $0x18] sm:$0xff]   ;;  %v875_v12 = vld [vmem:[%s1027_s1 + $0x20] sm:$0xff]   ;;  %v876_v13 = vld [vmem:[%s1027_s1 + $0x28] sm:$0xff]  }
  0x17   :  { %v877_v14 = vld [vmem:[%s1027_s1 + $0x30] sm:$0xff]   ;;  %v878_v15 = vld [vmem:[%s1027_s1 + $0x38] sm:$0xff]   ;;  %v879_v16 = vld [vmem:[%s1026_s0] sm:$0xff]  }
  0x18   :  { %799 = vmatpush3.bf16.msra.mxu0 %v864_v1  ;;  %844 = vmatprep.mubr.bf16.mxu1 %v879_v16  ;;  %v880_v41 = vld [vmem:[%s1026_s0 + $0x8] sm:$0xff]   ;;  %v881_v42 = vld [vmem:[%s1026_s0 + $0x10] sm:$0xff]   ;;  %v882_v43 = vld [vmem:[%s1026_s0 + $0x18] sm:$0xff]  }
  0x19   :  { %800 = vmatprep.subr.bf16.mxu0 %v865_v2  ;;  %v883_v44 = vld [vmem:[%s1026_s0 + $0x20] sm:$0xff]   ;;  %v884_v45 = vld [vmem:[%s1026_s0 + $0x28] sm:$0xff]   ;;  %v885_v46 = vld [vmem:[%s1026_s0 + $0x30] sm:$0xff]  }
  0x1a   :  { %v886_v47 = vld [vmem:[%s1026_s0 + $0x38] sm:$0xff]   ;;  %v684_v48 = vld [vmem:[%s1029_s3] ss:$0 sm:$0xff] }
  0x1c   :  { %801 = vmatpush3.bf16.msra.mxu0 %v865_v2 }
  0x1d   :  { %802 = vmatprep.subr.bf16.mxu0 %v866_v3 }
  0x20   :  { %803 = vmatpush3.bf16.msra.mxu0 %v866_v3 }
  0x21   :  { %804 = vmatprep.subr.bf16.mxu0 %v867_v5 }
  0x24   :  { %805 = vmatpush3.bf16.msra.mxu0 %v867_v5 }
  0x25   :  { %806 = vmatprep.subr.bf16.mxu0 %v868_v6 }
  0x28   :  { %807 = vmatpush3.bf16.msra.mxu0 %v868_v6 }
  0x29   :  { %808 = vmatprep.subr.bf16.mxu0 %v869_v7 }
  0x2c   :  { %809 = vmatpush3.bf16.msra.mxu0 %v869_v7 }
  0x2d   :  { %810 = vmatprep.subr.bf16.mxu0 %v870_v8 }
  0x30   :  { %811 = vmatpush3.bf16.msra.mxu0 %v870_v8 }
  0x33   :  { %813 = vmatmul.mubr.bf16.vlgmr.msra.gmra.mrb[0].mxu0 %v872_v9 }
  0x34   :  { %816 = vmatprep.mubr.bf16.mxu0 %v873_v10 }
  0x3b   :  { %817 = vmatmul.mubr.bf16.gmra.mrb[4].mxu0 %v874_v11 }
  0x3c   :  { %820 = vmatprep.mubr.bf16.mxu0 %v875_v12 }
  0x43   :  { %821 = vmatmul.mubr.bf16.gmra.mrb[8].mxu0 %v876_v13 }
  0x44   :  { %824 = vmatprep.mubr.bf16.mxu0 %v877_v14 }
  0x4b   :  { %825 = vmatmul.mubr.bf16.gmra.mrb[12].mxu0 %v878_v15 }
 0x106   :  { %v814_v17 = vpop.f32.mrb[0].mxu0 }
 0x107   :  { %v198_v18 = vpop.f32.mrb[1].mxu0 }
 0x108   :  { %v815_v19 = vpop.f32.mrb[2].mxu0 }
 0x109   :  { %v262_v20 = vpack.c.bf16 %v815_v19, %v814_v17  ;;  %v201_v21 = vpop.f32.mrb[3].mxu0 }
 0x10a   :  { %v261_v22 = vpack.c.bf16 %v201_v21, %v198_v18 }
 0x10c   :  { %828 = vmatprep.subr.bf16.mxu1 %v261_v22 }
 0x10d   :  { %829 = vmatpush3.bf16.msra.mxu1 %v261_v22 }
 0x10e   :  { %v818_v23 = vpop.f32.mrb[4].mxu0  ;;  %830 = vmatprep.subr.bf16.mxu1 %v262_v20 }
 0x10f   :  { %v214_v24 = vpop.f32.mrb[5].mxu0 }
 0x110   :  { %v819_v25 = vpop.f32.mrb[6].mxu0 }
 0x111   :  { %v264_v26 = vpack.c.bf16 %v819_v25, %v818_v23  ;;  %v217_v27 = vpop.f32.mrb[7].mxu0  ;;  %831 = vmatpush3.bf16.msra.mxu1 %v262_v20 }
 0x112   :  { %v263_v28 = vpack.c.bf16 %v217_v27, %v214_v24 }
 0x114   :  { %832 = vmatprep.subr.bf16.mxu1 %v263_v28 }
 0x115   :  { %833 = vmatpush3.bf16.msra.mxu1 %v263_v28 }
 0x116   :  { %v822_v29 = vpop.f32.mrb[8].mxu0  ;;  %834 = vmatprep.subr.bf16.mxu1 %v264_v26 }
 0x117   :  { %v230_v30 = vpop.f32.mrb[9].mxu0 }
 0x118   :  { %v823_v31 = vpop.f32.mrb[10].mxu0 }
 0x119   :  { %v266_v32 = vpack.c.bf16 %v823_v31, %v822_v29  ;;  %v233_v33 = vpop.f32.mrb[11].mxu0  ;;  %835 = vmatpush3.bf16.msra.mxu1 %v264_v26 }
 0x11a   :  { %v265_v34 = vpack.c.bf16 %v233_v33, %v230_v30 }
 0x11c   :  { %836 = vmatprep.subr.bf16.mxu1 %v265_v34 }
 0x11d   :  { %837 = vmatpush3.bf16.msra.mxu1 %v265_v34 }
 0x11e   :  { %v826_v35 = vpop.f32.mrb[12].mxu0  ;;  %838 = vmatprep.subr.bf16.mxu1 %v266_v32 }
 0x11f   :  { %v246_v36 = vpop.f32.mrb[13].mxu0 }
 0x120   :  { %v827_v37 = vpop.f32.mrb[14].mxu0 }
 0x121   :  { %v268_v38 = vpack.c.bf16 %v827_v37, %v826_v35  ;;  %v249_v39 = vpop.f32.mrb[15].mxu0  ;;  %839 = vmatpush3.bf16.msra.mxu1 %v266_v32 }
 0x122   :  { %v267_v40 = vpack.c.bf16 %v249_v39, %v246_v36 }
 0x124   :  { %840 = vmatprep.subr.bf16.mxu1 %v267_v40 }
 0x125   :  { %841 = vmatpush3.bf16.msra.mxu1 %v267_v40 }
 0x126   :  { %842 = vmatprep.subr.bf16.mxu1 %v268_v38 }
 0x129   :  { %843 = vmatpush3.bf16.msra.mxu1 %v268_v38 }
 0x12c   :  { %845 = vmatmul.mubr.bf16.vlgmr.msra.gmra.mrb[0].mxu1 %v880_v41 }
 0x12d   :  { %848 = vmatprep.mubr.bf16.mxu1 %v881_v42 }
 0x134   :  { %849 = vmatmul.mubr.bf16.gmra.mrb[4].mxu1 %v882_v43 }
 0x135   :  { %852 = vmatprep.mubr.bf16.mxu1 %v883_v44 }
 0x13c   :  { %853 = vmatmul.mubr.bf16.gmra.mrb[8].mxu1 %v884_v45 }
 0x13d   :  { %856 = vmatprep.mubr.bf16.mxu1 %v885_v46 }
 0x144   :  { %857 = vmatmul.mubr.bf16.gmra.mrb[12].mxu1 %v886_v47 }
 0x1ff   :  { %v846_v49 = vpop.f32.mrb[0].mxu1 }
 0x200   :  { %v543_v50 = vadd.f32 %v846_v49, %v684_v48  ;;  %v420_v51 = vpop.f32.mrb[1].mxu1 }
 0x201   :  { %v541_v52 = vadd.f32 %v684_v48, %v420_v51  ;;  %v847_v53 = vpop.f32.mrb[2].mxu1 }
 0x202   :  { %v544_v54 = vadd.f32 %v847_v53, %v684_v48  ;;  %v423_v55 = vpop.f32.mrb[3].mxu1  ;;  %v559_v57 = vmax.f32 %v543_v50, 0.0 }
 0x203   :  { %v542_v56 = vadd.f32 %v684_v48, %v423_v55  ;;  %v557_v59 = vmax.f32 %v541_v52, 0.0 }
 0x204   :  { %v560_v58 = vmax.f32 %v544_v54, 0.0 }
 0x205   :  { %v558_v60 = vmax.f32 %v542_v56, 0.0 }
 0x206   :  { %v725_v61 = vpack.c.bf16 %v560_v58, %v559_v57 }
 0x207   :  { %v720_v62 = vpack.c.bf16 %v558_v60, %v557_v59  ;;  %v850_v63 = vpop.f32.mrb[4].mxu1 }
 0x208   :  { %757 = vst [vmem:[%s1030_s4 + $0x8] sm:$0xff] %v725_v61   ;;  %v547_v0 = vadd.f32 %v850_v63, %v684_v48  ;;  %v436_v1 = vpop.f32.mrb[5].mxu1 }
 0x209   :  { %721 = vst [vmem:[%s1030_s4] sm:$0xff] %v720_v62   ;;  %v545_v2 = vadd.f32 %v684_v48, %v436_v1  ;;  %v851_v3 = vpop.f32.mrb[6].mxu1 }
 0x20a   :  { %v548_v4 = vadd.f32 %v851_v3, %v684_v48  ;;  %v439_v5 = vpop.f32.mrb[7].mxu1  ;;  %v563_v7 = vmax.f32 %v547_v0, 0.0 }
 0x20b   :  { %v546_v6 = vadd.f32 %v684_v48, %v439_v5  ;;  %v561_v9 = vmax.f32 %v545_v2, 0.0 }
 0x20c   :  { %v564_v8 = vmax.f32 %v548_v4, 0.0 }
 0x20d   :  { %v562_v10 = vmax.f32 %v546_v6, 0.0 }
 0x20e   :  { %v735_v11 = vpack.c.bf16 %v564_v8, %v563_v7 }
 0x20f   :  { %v730_v12 = vpack.c.bf16 %v562_v10, %v561_v9  ;;  %v854_v13 = vpop.f32.mrb[8].mxu1 }
 0x210   :  { %759 = vst [vmem:[%s1030_s4 + $0x18] sm:$0xff] %v735_v11   ;;  %v551_v14 = vadd.f32 %v854_v13, %v684_v48  ;;  %v452_v15 = vpop.f32.mrb[9].mxu1 }
 0x211   :  { %758 = vst [vmem:[%s1030_s4 + $0x10] sm:$0xff] %v730_v12   ;;  %v549_v16 = vadd.f32 %v684_v48, %v452_v15  ;;  %v855_v17 = vpop.f32.mrb[10].mxu1 }
 0x212   :  { %v552_v18 = vadd.f32 %v855_v17, %v684_v48  ;;  %v455_v19 = vpop.f32.mrb[11].mxu1  ;;  %v567_v21 = vmax.f32 %v551_v14, 0.0 }
 0x213   :  { %v550_v20 = vadd.f32 %v684_v48, %v455_v19  ;;  %v565_v23 = vmax.f32 %v549_v16, 0.0 }
 0x214   :  { %v568_v22 = vmax.f32 %v552_v18, 0.0 }
 0x215   :  { %v566_v24 = vmax.f32 %v550_v20, 0.0 }
 0x216   :  { %v745_v25 = vpack.c.bf16 %v568_v22, %v567_v21 }
 0x217   :  { %v740_v26 = vpack.c.bf16 %v566_v24, %v565_v23  ;;  %v858_v27 = vpop.f32.mrb[12].mxu1 }
 0x218   :  { %761 = vst [vmem:[%s1030_s4 + $0x28] sm:$0xff] %v745_v25   ;;  %v555_v28 = vadd.f32 %v858_v27, %v684_v48  ;;  %v468_v29 = vpop.f32.mrb[13].mxu1 }
 0x219   :  { %760 = vst [vmem:[%s1030_s4 + $0x20] sm:$0xff] %v740_v26   ;;  %v553_v30 = vadd.f32 %v684_v48, %v468_v29  ;;  %v859_v31 = vpop.f32.mrb[14].mxu1 }
 0x21a   :  { %v556_v32 = vadd.f32 %v859_v31, %v684_v48  ;;  %v471_v33 = vpop.f32.mrb[15].mxu1  ;;  %v571_v35 = vmax.f32 %v555_v28, 0.0 }
 0x21b   :  { %v554_v34 = vadd.f32 %v684_v48, %v471_v33  ;;  %v569_v37 = vmax.f32 %v553_v30, 0.0 }
 0x21c   :  { %v572_v36 = vmax.f32 %v556_v32, 0.0 }
 0x21d   :  { %v570_v38 = vmax.f32 %v554_v34, 0.0 }
 0x21e   :  { %v755_v39 = vpack.c.bf16 %v572_v36, %v571_v35 }
 0x21f   :  { %v750_v40 = vpack.c.bf16 %v570_v38, %v569_v37 }
 0x220   :  { %763 = vst [vmem:[%s1030_s4 + $0x38] sm:$0xff] %v755_v39  }
 0x221   :  { %762 = vst [vmem:[%s1030_s4 + $0x30] sm:$0xff] %v750_v40  }
 0x222   :  { %657 = vsyncpa [#allocation5], 1 }

</bundles_post_ra>
